<compile_context>
chip_gen: v7x
topology: tpu7x:2x2x1
jax: 0.10.0
libtpu: 0.0.40
codegen_flags: <defaults>
</compile_context>

<pallas_src>
import functools

import jax
import jax.numpy as jnp
from jax.experimental import pallas as pl
from jax.experimental.pallas import tpu as pltpu

_LANES = 128


def _hloss_kernel(spacing_ref, x_ref, out_ref, *, spacing_len):
    # spacing_ref: (spacing_len,) f32 in SMEM (whole array, scalar path)
    # x_ref:       (tile_rows, 128) f32 in VMEM (lane-dense tile)
    # out_ref:     (1, 1) f32 accumulator, resident across the whole grid
    step = pl.program_id(0)

    @pl.when(step == 0)
    def _():
        out_ref[...] = jnp.zeros_like(out_ref)

    xv = x_ref[...]
    # Padded elements (if any) are 1.0, so x*log(x) == 0 for them.
    out_ref[...] += jnp.sum(xv * jnp.log(xv), keepdims=True)  # -> (1, 1)

    @pl.when(step == pl.num_programs(0) - 1)
    def _():
        vol = spacing_ref[0]
        for i in range(1, spacing_len):  # static, tiny loop over spacing dims
            vol = vol * spacing_ref[i]
        out_ref[...] = out_ref[...] * (-vol)


def hloss(x, spacing, *, max_tile_rows=512):
    """-(x * log(x)).sum() * spacing.prod(), computed in one Pallas kernel."""
    n = int(x.size)
    rows = pl.cdiv(n, _LANES)
    # tile_rows: multiple of 8, as large as reasonable, capped by max_tile_rows.
    tile_rows = min(int(max_tile_rows), ((rows + 7) // 8) * 8)
    tile_rows = max(8, (tile_rows // 8) * 8)
    num_tiles = pl.cdiv(rows, tile_rows)
    rows_padded = num_tiles * tile_rows
    padded = rows_padded * _LANES

    xf = x.reshape(-1).astype(jnp.float32)
    if padded != n:
        # Pad with 1.0 so padded entries contribute 1*log(1) = 0 to the sum.
        xf = jnp.concatenate(
            [xf, jnp.ones((padded - n,), jnp.float32)])
    x2 = xf.reshape(rows_padded, _LANES)

    spacing_f = spacing.reshape(-1).astype(jnp.float32)
    spacing_len = int(spacing_f.shape[0])

    kernel = functools.partial(_hloss_kernel, spacing_len=spacing_len)

    out = pl.pallas_call(
        kernel,
        out_shape=jax.ShapeDtypeStruct((1, 1), jnp.float32),
        grid=(num_tiles,),
        in_specs=[
            # spacing: whole (tiny) array in SMEM, read on the scalar path.
            pl.BlockSpec(memory_space=pltpu.MemorySpace.SMEM),
            # x: lane-dense (tile_rows, 128) tiles streamed over the grid.
            pl.BlockSpec((tile_rows, _LANES), lambda i: (i, 0)),
        ],
        # Same block index for every grid step -> VMEM-resident accumulator.
        out_specs=pl.BlockSpec((1, 1), lambda i: (0, 0)),
        compiler_params=pltpu.CompilerParams(
            dimension_semantics=("arbitrary",)),  # reduction axis
        cost_estimate=pl.CostEstimate(
            flops=2 * padded + 2 * spacing_len,
            transcendentals=padded,
            bytes_accessed=4 * (padded + spacing_len + 1)),
    )(spacing_f, x2)
    return out[0, 0]


# ----------------------------------------------------------------------------
# Pure-JAX reference (for correctness check)
# ----------------------------------------------------------------------------
def _ref_hloss(x, spacing):
    vol = jnp.prod(spacing.astype(jnp.float32))
    b = x.astype(jnp.float32) * jnp.log(x.astype(jnp.float32))
    return -1.0 * jnp.sum(b) * vol


if __name__ == "__main__":
    # Small shapes consistent with the module: x is a positive (probability-
    # like) field of shape (N, C, H, W) = (2, 4, 16, 16); spacing has one
    # entry per spatial dim (2D -> length 2).
    key = jax.random.PRNGKey(0)
    k1, k2 = jax.random.split(key)
    x = jax.random.uniform(k1, (2, 4, 16, 16), jnp.float32,
                           minval=1e-3, maxval=1.0)
    spacing = jnp.array([0.5, 0.5], jnp.float32)

    ref = jax.block_until_ready(_ref_hloss(x, spacing))

    # Default tiling: whole input fits in one (16, 128) tile -> grid=(1,).
    out = jax.block_until_ready(hloss(x, spacing))
    assert out.shape == (), out.shape
    assert jnp.allclose(out, ref, rtol=1e-4, atol=1e-4), (
        float(out), float(ref))

    # Smaller tile to exercise the multi-step accumulate/finalize path.
    out2 = jax.block_until_ready(hloss(x, spacing, max_tile_rows=8))
    assert jnp.allclose(out2, ref, rtol=1e-4, atol=1e-4), (
        float(out2), float(ref))

    print("KERNEL_OK")
</pallas_src>

<mosaic_0001>
module attributes {stable_mosaic.version = 11 : i64} {
  func.func @_hloss_kernel(%arg0: i32, %arg1: memref<2xf32, #tpu.memory_space<smem>>, %arg2: memref<16x128xf32, #tpu.memory_space<vmem>>, %arg3: memref<1x1xf32, #tpu.memory_space<vmem>>) attributes {dimension_semantics = [#tpu.dimension_semantics<arbitrary>], iteration_bounds = array<i64: 1>, scalar_prefetch = 0 : i64, scratch_operands = 0 : i64, tpu.core_type = #tpu.core_type<tc>, window_params = [{transform_indices = @transform_0, window_bounds = array<i64: 2>}, {transform_indices = @transform_1, window_bounds = array<i64: 16, 128>}, {pipeline_mode = #tpu.pipeline_mode<synchronous>, transform_indices = @transform_2, window_bounds = array<i64: 1, 1>}]} {
    %c0_i32 = arith.constant 0 : i32
    %0 = arith.cmpi eq, %arg0, %c0_i32 : i32
    %1 = arith.extui %0 : i1 to i32
    %c0_i32_0 = arith.constant 0 : i32
    %2 = arith.cmpi ne, %1, %c0_i32_0 : i32
    scf.if %2 {
      %cst_8 = arith.constant 0.000000e+00 : f32
      %17 = vector.broadcast %cst_8 : f32 to vector<1x1xf32>
      %c0_9 = arith.constant 0 : index
      %c0_10 = arith.constant 0 : index
      %18 = vector.load %arg3[%c0_9, %c0_10] : memref<1x1xf32, #tpu.memory_space<vmem>>, vector<1x1xf32>
      tpu.vector_store %arg3[%c0_9, %c0_10], %17 {strides = array<i32>} : memref<1x1xf32, #tpu.memory_space<vmem>>, vector<1x1xf32>,
    } else {
    }
    %c0 = arith.constant 0 : index
    %c0_1 = arith.constant 0 : index
    %3 = vector.load %arg2[%c0, %c0_1] : memref<16x128xf32, #tpu.memory_space<vmem>>, vector<16x128xf32>
    %c0_2 = arith.constant 0 : index
    %c0_3 = arith.constant 0 : index
    %4 = vector.load %arg3[%c0_2, %c0_3] : memref<1x1xf32, #tpu.memory_space<vmem>>, vector<1x1xf32>
    %5 = math.log %3 : vector<16x128xf32>
    %6 = arith.mulf %3, %5 : vector<16x128xf32>
    %7 = vector.shape_cast %6 : vector<16x128xf32> to vector<1x16x128xf32>
    %cst = arith.constant dense<0.000000e+00> : vector<1xf32>
    %8 = vector.multi_reduction <add>, %7, %cst [1, 2] : vector<1x16x128xf32> to vector<1xf32>
    %9 = vector.shape_cast %8 : vector<1xf32> to vector<1x1x1xf32>
    %10 = vector.extract %9[0, 0, 0] : f32 from vector<1x1x1xf32>
    %11 = vector.broadcast %10 : f32 to vector<1x1xf32>
    %12 = arith.addf %4, %11 : vector<1x1xf32>
    %c0_4 = arith.constant 0 : index
    %c0_5 = arith.constant 0 : index
    %13 = vector.load %arg3[%c0_4, %c0_5] : memref<1x1xf32, #tpu.memory_space<vmem>>, vector<1x1xf32>
    tpu.vector_store %arg3[%c0_4, %c0_5], %12 {strides = array<i32>} : memref<1x1xf32, #tpu.memory_space<vmem>>, vector<1x1xf32>,
    %c0_i32_6 = arith.constant 0 : i32
    %14 = arith.cmpi eq, %arg0, %c0_i32_6 : i32
    %15 = arith.extui %14 : i1 to i32
    %c0_i32_7 = arith.constant 0 : i32
    %16 = arith.cmpi ne, %15, %c0_i32_7 : i32
    scf.if %16 {
      %c0_8 = arith.constant 0 : index
      %17 = memref.load %arg1[%c0_8] : memref<2xf32, #tpu.memory_space<smem>>
      %c1 = arith.constant 1 : index
      %18 = memref.load %arg1[%c1] : memref<2xf32, #tpu.memory_space<smem>>
      %19 = arith.mulf %17, %18 : f32
      %c0_9 = arith.constant 0 : index
      %c0_10 = arith.constant 0 : index
      %20 = vector.load %arg3[%c0_9, %c0_10] : memref<1x1xf32, #tpu.memory_space<vmem>>, vector<1x1xf32>
      %cst_11 = arith.constant 0.000000e+00 : f32
      %21 = arith.subf %cst_11, %19 : f32
      %22 = vector.broadcast %21 : f32 to vector<1x1xf32>
      %23 = arith.mulf %20, %22 : vector<1x1xf32>
      %c0_12 = arith.constant 0 : index
      %c0_13 = arith.constant 0 : index
      %24 = vector.load %arg3[%c0_12, %c0_13] : memref<1x1xf32, #tpu.memory_space<vmem>>, vector<1x1xf32>
      tpu.vector_store %arg3[%c0_12, %c0_13], %23 {strides = array<i32>} : memref<1x1xf32, #tpu.memory_space<vmem>>, vector<1x1xf32>,
    } else {
    }
    return
  }
  func.func @transform_0(%arg0: i32) -> i32 {
    %c0_i32 = arith.constant 0 : i32
    %c0_i32_0 = arith.constant 0 : i32
    return %c0_i32 : i32
  }
  func.func @transform_1(%arg0: i32) -> (i32, i32) {
    %c0_i32 = arith.constant 0 : i32
    %c0_i32_0 = arith.constant 0 : i32
    return %arg0, %c0_i32 : i32, i32
  }
  func.func @transform_2(%arg0: i32) -> (i32, i32) {
    %c0_i32 = arith.constant 0 : i32
    %c0_i32_0 = arith.constant 0 : i32
    %c0_i32_1 = arith.constant 0 : i32
    return %c0_i32, %c0_i32_0 : i32, i32
  }
}

</mosaic_0001>

<bundles_post_ra>
// kernel: tpu_custom_call.1
= control target key start
LH: loop header
LB: loop body
LE: loop exit
PB: predicated region body
PF: predicated region fallthrough
CT: control target
= control target key end

     0   :  { %7 = vsyncpa [#allocation5], 0  ;;  %s226_s0 = inlined_call_operand.hbm [shape: f32[2], index: 0, kind: input, shape index: {}]   ;;  %s227_s1 = inlined_call_operand.hbm [shape: f32[16,128], index: 1, kind: input, shape index: {}]   ;;  %s228_s2 = inlined_call_operand.hbm [shape: f32[1,1], index: 2, kind: output, shape index: {}]  }
   0x1   :  { %8 = vsyncpa [#allocation3], 0 }
   0x2   :  { %9 = vsyncpa [#allocation4], 0  ;;  %s106_s11 = scalar_lea.hbm %s226_s0, 16 }
   0x3   :  { %p107_p0 = scmp.ne.s32.totalorder %s226_s0, %s106_s11  ;;  %p110_p1 = scmp.lt.u32.totalorder %s106_s11, %s226_s0 }
   0x5   :  { %p112_p2 = pnand %p110_p1, %p107_p0 }
   0x7   :  { %115 = shalt.err (!%p112_p2)
}
   0x8   :  { %s166_s16 = smov [#allocation2]   ;;  %s167_s19 = smov [#allocation6]  }
   0x9   :  { %17 = dma.hbm_to_smem %s226_s0, 16, %s166_s16, [#allocation5]  }
   0xa   :  { %s23_s20 = sshll.u32 %s167_s19, 4  ;;  %s116_s23 = scalar_lea.hbm %s227_s1, 256  ;;  %s24_s20 = int_to_ptr.vmem [resolvable:$true] %s23_s20 }
   0xb   :  { %p117_p3 = scmp.ne.s32.totalorder %s227_s1, %s116_s23  ;;  %p120_p4 = scmp.lt.u32.totalorder %s116_s23, %s227_s1 }
   0xd   :  { %p122_p5 = pnand %p120_p4, %p117_p3 }
   0xf   :  { %125 = shalt.err (!%p122_p5)
}
  0x10   :  { %s126_s28 = scalar_lea.vmem %s24_s20, 256  ;;  %p131_p7 = scmp.lt.s32.totalorder %s24_s20, %s24_s20 }
  0x11   :  { %p127_p6 = scmp.ne.s32.totalorder %s24_s20, %s126_s28  ;;  %p132_p8 = scmp.lt.s32.totalorder %s126_s28, %s126_s28 }
  0x13   :  { %p133_p9 = por %p132_p8, %p131_p7 }
  0x15   :  { %p134_p10 = pnand %p133_p9, %p127_p6 }
  0x17   :  { %137 = shalt.err (!%p134_p10)
}
  0x18   :  { %s168_s0 = smov 128   ;;  %s169_s29 = smov 8  }
  0x19   :  { %29 = dma.hbm_to_vmem [thread:$0]  %s227_s1, 256, %s24_s20, [#allocation3], %s168_s0, %s168_s0, %s169_s29  }
  0x1a   :  { %160 = dma.done.wait [#allocation5], 16  }
  0x1b   :  { %161 = vsyncadd [#allocation5], 4294967280 }
  0x1c   :  { %162 = dma.done.wait [#allocation3], 256  }
  0x1d   :  { %163 = vsyncadd [#allocation3], 4294967040 }
  0x1e   :  { %36 = sfence }
  0x1f   :  { %v43_v0 = vld [vmem:[#allocation6] sm:$0xff]  ;;  %v44_v1 = vld [vmem:[#allocation6 + $0x8] sm:$0xff]  ;;  %vm41_vm0 = vcmask 0   ;;  %v170_v9 = vmov 0.0   ;;  %s69_s1 = sld [smem:[#allocation2]]  ;;  %s93_s4 = sld [smem:[#allocation2 + $0x1]] }
  0x20   :  { %102 = vlog2.f32 %v43_v0  ;;  %42 = vst.msk [vmem:[#allocation7] sm:$0x1] %vm41_vm0, %v170_v9  ;;  %s171_s8 = smov [#allocation7]  }
  0x21   :  { %104 = vlog2.f32 %v44_v1  ;;  %s83_s9 = sshll.u32 %s171_s8, 4  ;;  %s84_s9 = int_to_ptr.vmem [resolvable:$true] %s83_s9 }
  0x22   :  { %s138_s10 = scalar_lea.vmem %s84_s9, 16  ;;  %s142_s11 = scalar_lea.vmem %s84_s9, 32 }
  0x23   :  { %p139_p11 = scmp.ne.s32.totalorder %s84_s9, %s138_s10  ;;  %p143_p12 = scmp.lt.s32.totalorder %s84_s9, %s84_s9 }
  0x24   :  { %p144_p13 = scmp.lt.s32.totalorder %s142_s11, %s138_s10 }
  0x25   :  { %s71_s6 = smul.f32 %s93_s4, %s69_s1 }
  0x26   :  { %p145_p0 = por %p144_p13, %p143_p12 }
  0x27   :  { %v45_v17 = vld [vmem:[#allocation7] sm:$0x1]  ;;  %s73_s7 = ssub.f32 0.0, %s71_s6 }
  0x28   :  { %p146_p1 = pnand %p145_p0, %p139_p11 }
  0x29   :  { %v74_v20 = vstv %s73_s7 }
  0x2a   :  { %v103_v2 = vpop.eup %102 }
  0x2b   :  { %v105_v3 = vpop.eup %104  ;;  %v47_v4 = vmul.f32 0.6931472, %v103_v2 }
  0x2c   :  { %v49_v5 = vmul.f32 0.6931472, %v105_v3 }
  0x2d   :  { %v50_v6 = vmul.f32 %v47_v4, %v43_v0 }
  0x2e   :  { %v51_v7 = vmul.f32 %v49_v5, %v44_v1 }
  0x30   :  { %v52_v8 = vadd.f32 %v51_v7, %v50_v6 }
  0x32   :  { %53 = vadd.xlane.f32.xlu0 %v52_v8 }
  0xbf   :  { %v54_v10 = vpop.xlane.xlu0 %53 }
  0xc0   :  { %v55_v11 = vrot.slane %v54_v10, 4 }
  0xc2   :  { %v56_v12 = vadd.f32 %v55_v11, %v54_v10 }
  0xc4   :  { %v57_v13 = vrot.slane %v56_v12, 2 }
  0xc6   :  { %v58_v14 = vadd.f32 %v57_v13, %v56_v12 }
  0xc8   :  { %v59_v15 = vrot.slane %v58_v14, 1 }
  0xca   :  { %v60_v16 = vadd.f32 %v59_v15, %v58_v14 }
  0xcc   :  { %94 = vpush %v60_v16 }
  0xfd   :  { %s95_s5 = spop %94 }
  0xfe   :  { %v62_v18 = vstv %s95_s5 }
  0xff   :  { %v63_v19 = vadd.f32 %v62_v18, %v45_v17 }
 0x101   :  { %65 = vst.msk [vmem:[#allocation7] sm:$0x1] %vm41_vm0, %v63_v19 }
 0x108   :  { %v72_v21 = vld [vmem:[#allocation7] sm:$0x1] }
 0x109   :  { %v75_v22 = vmul.f32 %v74_v20, %v72_v21 }
 0x10b   :  { %76 = vst.msk [vmem:[#allocation7] sm:$0x1] %vm41_vm0, %v75_v22 }
 0x10c   :  { %149 = shalt.err (!%p146_p1)
}
 0x10d   :  { %s150_s14 = scalar_lea.hbm %s228_s2, 16 }
 0x10e   :  { %p151_p2 = scmp.ne.s32.totalorder %s228_s2, %s150_s14  ;;  %p154_p3 = scmp.lt.u32.totalorder %s150_s14, %s228_s2 }
 0x110   :  { %p156_p4 = pnand %p154_p3, %p151_p2 }
 0x112   :  { %159 = shalt.err (!%p156_p4)
}
 0x113   :  { %86 = dma.vmem_to_hbm [thread:$0]  %s84_s9, 16, %s228_s2, [#allocation4]  }
 0x114   :  { %164 = dma.done.wait [#allocation4], 16  }
 0x115   :  { %165 = vsyncadd [#allocation4], 4294967280 }
 0x116   :  { %90 = vsyncpa [#allocation3], 1 }
 0x117   :  { %91 = vsyncpa [#allocation4], 1 }
 0x118   :  { %92 = vsyncpa [#allocation5], 1 }

</bundles_post_ra>
